<compile_context>
chip_gen: v7x
topology: tpu7x:2x2x1
jax: 0.10.0
libtpu: 0.0.40
codegen_flags: <defaults>
</compile_context>

<pallas_src>
import functools
import math

import jax
import jax.numpy as jnp
from jax.experimental import pallas as pl
from jax.experimental.pallas import tpu as pltpu


def _round_up(x, m):
    return (x + m - 1) // m * m


def _cdiv(a, b):
    return -(-a // b)


def _sublane(dtype):
    itemsize = jnp.dtype(dtype).itemsize
    return {1: 32, 2: 16}.get(itemsize, 8)


def _vmem_capacity():
    try:
        return int(pltpu.get_tpu_info().vmem_capacity_bytes)
    except Exception:
        return 64 << 20  # conservative fallback (v7x physical VMEM)


# ---------------------------------------------------------------------------
# Fused single-pass kernel: pool + block-diag 1x1 conv + sigmoid + gate.
# Block = (R, HW) with R = k*C (k whole samples), resident in VMEM.
# ---------------------------------------------------------------------------
def _fused_kernel(x_ref, wbd_ref, brep_ref, o_ref, *, nc, block_rows, partial):
    x = x_ref[...]                                                  # (R, HW)
    s = jnp.sum(x, axis=-1, keepdims=True, dtype=jnp.float32)       # (R, 1) pooled sums
    if partial:
        # Last block overhangs N*C rows: zero the garbage row sums so they
        # cannot poison valid rows through the block-diagonal matmul
        # (0 * NaN = NaN otherwise).
        row = jax.lax.broadcasted_iota(jnp.int32, s.shape, 0)
        s = jnp.where(pl.program_id(0) * block_rows + row < nc, s, 0.0)
    # z[r] = sum_c wbd[r, c] * s[c]  (wbd already carries the 1/HW factor).
    s_wide = jnp.broadcast_to(s, (s.shape[0], 128))
    z = jnp.dot(wbd_ref[...], s_wide, preferred_element_type=jnp.float32)
    z = z[:, 0:1] + brep_ref[...]                                   # (R, 1)
    att = 1.0 / (1.0 + jnp.exp(-z))                                 # sigmoid
    o_ref[...] = x * att.astype(x.dtype)


def _fused_plan(N, C, HW, dtype):
    """Return (k_samples_per_block, vmem_limit) for the fused path, or None."""
    itemsize = jnp.dtype(dtype).itemsize
    sub = _sublane(dtype)
    vmem_cap = _vmem_capacity()
    slab_cap = max(1 << 20, vmem_cap // 6)  # 2x in-buf + 2x out-buf + wbd + headroom
    per_sample = C * HW * itemsize
    g = sub // math.gcd(C, sub)             # k granularity so (k*C) % sub == 0
    k_cap = min(N, slab_cap // per_sample, max(1, 1024 // C))
    if k_cap >= g:
        k = (k_cap // g) * g
        # Prefer >= 2 row blocks (keeps both v7x TensorCores busy; ~free on 1-TC chips).
        if _cdiv(N, k) < 2 and N >= 2 * g:
            k = max(g, (N // 2) // g * g)
    elif N * C <= 1024 and N * per_sample <= slab_cap:
        k = N                                # single block spanning the full row extent
    else:
        return None
    R = k * C
    need = 4 * R * HW * itemsize + 2 * R * R * 4 + 8 * R * 4 + (2 << 20)
    vmem_limit = int(min(vmem_cap - (8 << 20), max(16 << 20, need)))
    return k, vmem_limit


# ---------------------------------------------------------------------------
# Two-stage fallback: stage 1 pooled partial sums (f32, lane-dense accumulator).
# ---------------------------------------------------------------------------
def _pool_sum_kernel(x_ref, s_ref, *, hw, hw_tile, out_w):
    j = pl.program_id(1)

    @pl.when(j == 0)
    def _():
        s_ref[...] = jnp.zeros_like(s_ref)

    x = x_ref[...]
    if hw % hw_tile:
        # Partial last HW tile: zero out-of-range lanes (garbage reads).
        lane = jax.lax.broadcasted_iota(jnp.int32, x.shape, 1)
        x = jnp.where(j * hw_tile + lane < hw, x, jnp.zeros_like(x))
    if out_w == 1:
        s_ref[...] += jnp.sum(x, axis=-1, keepdims=True, dtype=jnp.float32)
    else:
        # Lane-dense f32 accumulator: fold hw_tile lanes into 128-wide groups
        # with plain VALU adds (no per-tile cross-lane XLU reduce, dense vst).
        acc = s_ref[...]
        for t in range(hw_tile // out_w):
            acc = acc + x[:, t * out_w:(t + 1) * out_w].astype(jnp.float32)
        s_ref[...] = acc


def _gate_kernel(x_ref, s_ref, o_ref):
    o_ref[...] = x_ref[...] * s_ref[...]


def _choose_tiles(nc, hw, dtype, block_bytes_cap=4 << 20, lane_cap=8192):
    itemsize = jnp.dtype(dtype).itemsize
    sub = _sublane(dtype)
    # Balanced HW split: tiles are multiples of 128 (pad waste < 128 lanes per
    # row), or the full HW extent when a single tile suffices.
    n_hw = _cdiv(hw, lane_cap)
    hw_tile = hw if n_hw == 1 else _round_up(_cdiv(hw, n_hw), 128)
    # Balanced row split under a ~4 MiB per-block byte budget.
    row_cap = max(sub, (block_bytes_cap // max(1, hw_tile * itemsize)) // sub * sub)
    n_r = _cdiv(nc, row_cap)
    rows = _round_up(_cdiv(nc, n_r), sub)
    if nc >= 2 * sub:                         # keep >= 2 parallel row blocks (megacore)
        rows = min(rows, _round_up(_cdiv(nc, 2), sub))
    if rows > nc:                             # tiny NC: full-extent block
        rows = nc
    return rows, hw_tile


# ---------------------------------------------------------------------------
# Public wrapper
# ---------------------------------------------------------------------------
def channel_attention_block(x, weight, bias, *, force_two_stage=False):
    """x: (N, C, H, W). weight: (Cout, Cin) squeezed 1x1-conv kernel. bias: (Cout,).
    Returns (N, C, H, W).  The `x * x_c` broadcast requires Cout == Cin == C."""
    N, C, H, W = x.shape
    Cout, Cin = weight.shape
    assert Cin == C and Cout == C, "x * x_c broadcast requires Cout == Cin == C"
    HW = H * W
    NC = N * C
    dtype = x.dtype
    itemsize = jnp.dtype(dtype).itemsize

    x_flat = x.reshape(NC, HW)
    w32 = weight.astype(jnp.float32)
    b32 = bias.astype(jnp.float32)
    inv_hw = 1.0 / HW

    plan = None if force_two_stage else _fused_plan(N, C, HW, dtype)

    if plan is not None:
        # ----- fused single-pass path -----
        k, vmem_limit = plan
        R = k * C
        n_blocks = _cdiv(N, k)
        wbd = jnp.kron(jnp.eye(k, dtype=jnp.float32), w32 * inv_hw)     # (R, R)
        brep = jnp.tile(b32, k)[:, None]                                # (R, 1)
        kernel = functools.partial(_fused_kernel, nc=NC, block_rows=R,
                                   partial=(N % k) != 0)
        out = pl.pallas_call(
            kernel,
            out_shape=jax.ShapeDtypeStruct((NC, HW), dtype),
            grid=(n_blocks,),
            in_specs=[
                pl.BlockSpec((R, HW), lambda i: (i, 0)),
                pl.BlockSpec((R, R), lambda i: (0, 0)),
                pl.BlockSpec((R, 1), lambda i: (0, 0)),
            ],
            out_specs=pl.BlockSpec((R, HW), lambda i: (i, 0)),
            compiler_params=pltpu.CompilerParams(
                dimension_semantics=("parallel",),
                vmem_limit_bytes=vmem_limit,
            ),
        )(x_flat, wbd, brep)
        return out.reshape(N, C, H, W)

    # ----- two-stage fallback (per-sample slab too big for VMEM) -----
    rows, hw_tile = _choose_tiles(NC, HW, dtype)
    out_w = 128 if hw_tile % 128 == 0 else 1
    vmem_cap = _vmem_capacity()
    block_bytes = rows * hw_tile * itemsize
    vmem_limit = int(min(vmem_cap - (8 << 20),
                         max(16 << 20, 5 * block_bytes + (2 << 20))))
    grid = (_cdiv(NC, rows), _cdiv(HW, hw_tile))

    # Stage 1: pooled f32 partial sums; reduction (HW) axis last / "arbitrary".
    sums = pl.pallas_call(
        functools.partial(_pool_sum_kernel, hw=HW, hw_tile=hw_tile, out_w=out_w),
        out_shape=jax.ShapeDtypeStruct((NC, out_w), jnp.float32),
        grid=grid,
        in_specs=[pl.BlockSpec((rows, hw_tile), lambda i, j: (i, j))],
        out_specs=pl.BlockSpec((rows, out_w), lambda i, j: (i, 0)),
        compiler_params=pltpu.CompilerParams(
            dimension_semantics=("parallel", "arbitrary"),
            vmem_limit_bytes=vmem_limit,
        ),
    )(x_flat)

    # Tiny attention stage in plain XLA (O(N*C + C^2) values; 1/HW folded into W).
    pooled = jnp.sum(sums, axis=1).reshape(N, C)                         # f32 sums
    att = jnp.dot(pooled, (w32 * inv_hw).T,
                  precision=jax.lax.Precision.HIGHEST) + b32[None, :]
    att = jax.nn.sigmoid(att).astype(dtype)                              # (N, C)
    scale = att.reshape(NC, 1)

    # Stage 2: lane-dense elementwise gating (both axes parallel).
    out = pl.pallas_call(
        _gate_kernel,
        out_shape=jax.ShapeDtypeStruct((NC, HW), dtype),
        grid=grid,
        in_specs=[
            pl.BlockSpec((rows, hw_tile), lambda i, j: (i, j)),
            pl.BlockSpec((rows, 1), lambda i, j: (i, 0)),
        ],
        out_specs=pl.BlockSpec((rows, hw_tile), lambda i, j: (i, j)),
        compiler_params=pltpu.CompilerParams(
            dimension_semantics=("parallel", "parallel"),
            vmem_limit_bytes=vmem_limit,
        ),
    )(x_flat, scale)
    # TODO(synk): if the caller can donate x, pass input_output_aliases={0: 0}
    # here so the gate writes in place and saves an NC*HW HBM allocation.
    return out.reshape(N, C, H, W)


# ---------------------------------------------------------------------------
# Reference + tests
# ---------------------------------------------------------------------------
def _reference(x, weight, bias):
    xf = x.astype(jnp.float32)
    pooled = jnp.mean(xf, axis=(2, 3))                                   # (N, C)
    att = jnp.dot(pooled, weight.astype(jnp.float32).T,
                  precision=jax.lax.Precision.HIGHEST) + bias.astype(jnp.float32)[None, :]
    att = jax.nn.sigmoid(att)
    return xf * att[:, :, None, None]


def _check(out, x, w, b, atol, rtol):
    ref = _reference(x, w, b)
    assert out.shape == x.shape and out.dtype == x.dtype
    assert jnp.allclose(out.astype(jnp.float32), ref, atol=atol, rtol=rtol), \
        f"mismatch: max abs diff {jnp.max(jnp.abs(out.astype(jnp.float32) - ref))}"


if __name__ == "__main__":
    key = jax.random.PRNGKey(0)

    def make(shape, dtype, k):
        kx, kw, kb = jax.random.split(k, 3)
        C = shape[1]
        x = jax.random.normal(kx, shape, dtype=jnp.float32).astype(dtype)
        w = jax.random.normal(kw, (C, C), dtype=jnp.float32) * (1.0 / C) ** 0.5
        b = jax.random.normal(kb, (C,), dtype=jnp.float32) * 0.01
        return x, w, b

    k0, k1, k2, k3 = jax.random.split(key, 4)
    # f32 tolerance covers MXU multi-pass vs XLA matmul rounding differences.
    F32_TOL = dict(atol=1e-3, rtol=1e-3)

    # (a) primary: fused single-pass path, aligned f32 case.
    x, w, b = make((2, 4, 16, 16), jnp.float32, k0)
    out = jax.block_until_ready(channel_attention_block(x, w, b))
    _check(out, x, w, b, **F32_TOL)

    # (b) fused path with a partial (row-masked) last sample block.
    x, w, b = make((5, 8, 16, 16), jnp.float32, k1)
    out = jax.block_until_ready(channel_attention_block(x, w, b))
    _check(out, x, w, b, **F32_TOL)

    # (c) two-stage fallback with misaligned HW (masked reduction edge tile).
    x, w, b = make((1, 8, 95, 95), jnp.float32, k2)
    out = jax.block_until_ready(channel_attention_block(x, w, b, force_two_stage=True))
    _check(out, x, w, b, **F32_TOL)

    # (d) bf16 input: gate is quantized to bf16, so looser tolerance.
    x, w, b = make((4, 8, 8, 8), jnp.bfloat16, k3)
    out = jax.block_until_ready(channel_attention_block(x, w, b))
    _check(out, x, w, b, atol=2e-2, rtol=3e-2)

    print("KERNEL_OK")
</pallas_src>

<mosaic_0001>
module attributes {stable_mosaic.version = 11 : i64} {
  func.func @_fused_kernel(%arg0: i32, %arg1: memref<8x256xf32, #tpu.memory_space<vmem>>, %arg2: memref<8x8xf32, #tpu.memory_space<vmem>>, %arg3: memref<8x1xf32, #tpu.memory_space<vmem>>, %arg4: memref<8x256xf32, #tpu.memory_space<vmem>>) attributes {dimension_semantics = [#tpu.dimension_semantics<parallel>], iteration_bounds = array<i64: 1>, scalar_prefetch = 0 : i64, scratch_operands = 0 : i64, tpu.core_type = #tpu.core_type<tc>, window_params = [{transform_indices = @transform_0, window_bounds = array<i64: 8, 256>}, {pipeline_mode = #tpu.pipeline_mode<synchronous>, transform_indices = @transform_1, window_bounds = array<i64: 8, 8>}, {pipeline_mode = #tpu.pipeline_mode<synchronous>, transform_indices = @transform_2, window_bounds = array<i64: 8, 1>}, {transform_indices = @transform_3, window_bounds = array<i64: 8, 256>}]} {
    %c0 = arith.constant 0 : index
    %c0_0 = arith.constant 0 : index
    %0 = vector.load %arg1[%c0, %c0_0] : memref<8x256xf32, #tpu.memory_space<vmem>>, vector<8x256xf32>
    %cst = arith.constant dense<0.000000e+00> : vector<8xf32>
    %1 = vector.multi_reduction <add>, %0, %cst [1] : vector<8x256xf32> to vector<8xf32>
    %2 = vector.shape_cast %1 : vector<8xf32> to vector<8x1xf32>
    %3 = vector.shape_cast %2 : vector<8x1xf32> to vector<8x1xf32>
    %4 = vector.broadcast %3 : vector<8x1xf32> to vector<8x128xf32>
    %c0_1 = arith.constant 0 : index
    %c0_2 = arith.constant 0 : index
    %5 = vector.load %arg2[%c0_1, %c0_2] : memref<8x8xf32, #tpu.memory_space<vmem>>, vector<8x8xf32>
    %cst_3 = arith.constant dense<0.000000e+00> : vector<8x128xf32>
    %6 = tpu.matmul %5, %4, %cst_3 {dimension_numbers = #tpu.dot_dimension_numbers<[1], [0], [0], [1], [0, 0, 1, 1], [], []>} : vector<8x8xf32>, vector<8x128xf32>, vector<8x128xf32> -> vector<8x128xf32>
    %7 = vector.extract_strided_slice %6 {offsets = [0, 0], sizes = [8, 1], strides = [1, 1]} : vector<8x128xf32> to vector<8x1xf32>
    %c0_4 = arith.constant 0 : index
    %c0_5 = arith.constant 0 : index
    %8 = vector.load %arg3[%c0_4, %c0_5] : memref<8x1xf32, #tpu.memory_space<vmem>>, vector<8x1xf32>
    %9 = arith.addf %7, %8 : vector<8x1xf32>
    %cst_6 = arith.constant 0.000000e+00 : f32
    %10 = vector.broadcast %cst_6 : f32 to vector<8x1xf32>
    %11 = arith.subf %10, %9 : vector<8x1xf32>
    %12 = math.exp %11 : vector<8x1xf32>
    %cst_7 = arith.constant 1.000000e+00 : f32
    %13 = vector.broadcast %cst_7 : f32 to vector<8x1xf32>
    %14 = arith.addf %13, %12 : vector<8x1xf32>
    %cst_8 = arith.constant 1.000000e+00 : f32
    %15 = vector.broadcast %cst_8 : f32 to vector<8x1xf32>
    %16 = arith.divf %15, %14 : vector<8x1xf32>
    %17 = vector.broadcast %16 : vector<8x1xf32> to vector<8x256xf32>
    %18 = arith.mulf %0, %17 : vector<8x256xf32>
    %c0_9 = arith.constant 0 : index
    %c0_10 = arith.constant 0 : index
    %19 = vector.load %arg4[%c0_9, %c0_10] : memref<8x256xf32, #tpu.memory_space<vmem>>, vector<8x256xf32>
    tpu.vector_store %arg4[%c0_9, %c0_10], %18 {strides = array<i32>} : memref<8x256xf32, #tpu.memory_space<vmem>>, vector<8x256xf32>,
    return
  }
  func.func @transform_0(%arg0: i32) -> (i32, i32) {
    %c0_i32 = arith.constant 0 : i32
    %c0_i32_0 = arith.constant 0 : i32
    return %arg0, %c0_i32 : i32, i32
  }
  func.func @transform_1(%arg0: i32) -> (i32, i32) {
    %c0_i32 = arith.constant 0 : i32
    %c0_i32_0 = arith.constant 0 : i32
    %c0_i32_1 = arith.constant 0 : i32
    return %c0_i32, %c0_i32_0 : i32, i32
  }
  func.func @transform_2(%arg0: i32) -> (i32, i32) {
    %c0_i32 = arith.constant 0 : i32
    %c0_i32_0 = arith.constant 0 : i32
    %c0_i32_1 = arith.constant 0 : i32
    return %c0_i32, %c0_i32_0 : i32, i32
  }
  func.func @transform_3(%arg0: i32) -> (i32, i32) {
    %c0_i32 = arith.constant 0 : i32
    %c0_i32_0 = arith.constant 0 : i32
    return %arg0, %c0_i32 : i32, i32
  }
}

</mosaic_0001>

<bundles_post_ra>
// kernel: tpu_custom_call.1
= control target key start
LH: loop header
LB: loop body
LE: loop exit
PB: predicated region body
PF: predicated region fallthrough
CT: control target
= control target key end

     0   :  { %8 = vsyncpa [#allocation3], 0  ;;  %s260_s0 = inlined_call_operand.hbm [shape: f32[8,256], index: 0, kind: input, shape index: {}]   ;;  %s261_s1 = inlined_call_operand.vmem [shape: f32[8,8], index: 1, kind: input, shape index: {}]   ;;  %s262_s2 = inlined_call_operand.vmem [shape: f32[8,1], index: 2, kind: input, shape index: {}]   ;;  %s263_s3 = inlined_call_operand.hbm [shape: f32[8,256], index: 3, kind: output, shape index: {}]  }
   0x1   :  { %9 = vsyncpa [#allocation4], 0  ;;  %s205_s12 = smov [#allocation2]   ;;  %s157_s16 = scalar_lea.hbm %s260_s0, 256 }
   0x2   :  { %s16_s13 = sshll.u32 %s205_s12, 4  ;;  %p158_p0 = scmp.ne.s32.totalorder %s260_s0, %s157_s16  ;;  %s17_s13 = int_to_ptr.vmem [resolvable:$true] %s16_s13 }
   0x3   :  { %p161_p1 = scmp.lt.u32.totalorder %s157_s16, %s260_s0 }
   0x5   :  { %p163_p2 = pnand %p161_p1, %p158_p0 }
   0x7   :  { %166 = shalt.err (!%p163_p2)
}
   0x8   :  { %s167_s21 = scalar_lea.vmem %s17_s13, 256  ;;  %p172_p4 = scmp.lt.s32.totalorder %s17_s13, %s17_s13 }
   0x9   :  { %p168_p3 = scmp.ne.s32.totalorder %s17_s13, %s167_s21  ;;  %p173_p5 = scmp.lt.s32.totalorder %s167_s21, %s167_s21 }
   0xb   :  { %p174_p6 = por %p173_p5, %p172_p4 }
   0xd   :  { %p175_p7 = pnand %p174_p6, %p168_p3 }
   0xf   :  { %178 = shalt.err (!%p175_p7)
}
  0x10   :  { %19 = dma.hbm_to_vmem [thread:$0]  %s260_s0, 256, %s17_s13, [#allocation3]  }
  0x11   :  { %201 = dma.done.wait [#allocation3], 256  }
  0x12   :  { %202 = vsyncadd [#allocation3], 4294967040  ;;  %v206_v0 = vmov 0.0   ;;  %v27_v1 = vld [vmem:[#allocation2] sm:$0xff]  ;;  %v28_v2 = vld [vmem:[#allocation2 + $0x8] sm:$0xff]  ;;  %vm207_vm0 = vmmov 0  }
  0x13   :  { %142 = vmatprep.subr.mxu0 %v206_v0  ;;  %v29_v3 = vadd.f32 %v28_v2, %v27_v1  ;;  %144 = vmatprep.mubr.msk.f32.mxu0 %vm207_vm0, %v206_v0  ;;  %v32_v4 = vld [vmem:[%s261_s1] sm:$0xff]  ;;  %vm33_vm1 = vcmask 64512   ;;  %v208_v6 = vmov 0   ;;  %s209_s1 = smov [#allocation5]  }
  0x14   :  { %152 = vset.pattern.permute.xlu0 %v208_v6  ;;  %v107_v7 = vld [vmem:[%s262_s2] sm:$0xff]  ;;  %s130_s27 = sshll.u32 %s209_s1, 4  ;;  %s131_s27 = int_to_ptr.vmem [resolvable:$true] %s130_s27 }
  0x15   :  { %30 = vadd.xlane.f32.xlu0 %v29_v3  ;;  %s179_s2 = scalar_lea.vmem %s131_s27, 256  ;;  %p184_p9 = scmp.lt.s32.totalorder %s131_s27, %s131_s27 }
  0x16   :  { %p180_p8 = scmp.ne.s32.totalorder %s131_s27, %s179_s2  ;;  %p185_p10 = scmp.lt.s32.totalorder %s179_s2, %s179_s2 }
  0x18   :  { %p186_p11 = por %p185_p10, %p184_p9 }
  0x1a   :  { %p187_p12 = pnand %p186_p11, %p180_p8 }
  0xa2   :  { %v31_v5 = vpop.xlane.xlu0 %30 }
  0xa3   :  { %143 = vmatpush3.msra.mxu0 %v31_v5 }
  0xa4   :  { %145 = vmatmul.mubr.msk.f32.vlgmr.msra.gmra.mrb[0].mxu0 %vm33_vm1, %v32_v4 }
 0x177   :  { %v103_v8 = vpop.f32.mrb[0].mxu0 }
 0x178   :  { %v108_v9 = vadd.f32 %v107_v7, %v103_v8  ;;  %v146_v10 = vpop.f32.mrb[1].mxu0 }
 0x17a   :  { %v109_v11 = vsub.f32 0.0, %v108_v9 }
 0x17c   :  { %v110_v12 = vmul.f32 1.442695, %v109_v11 }
 0x17e   :  { %153 = vpow2.f32 %v110_v12 }
 0x188   :  { %v154_v13 = vpop.eup %153 }
 0x189   :  { %v112_v14 = vadd.f32 1.0, %v154_v13 }
 0x18b   :  { %155 = vrcp.f32 %v112_v14 }
 0x195   :  { %v156_v15 = vpop.eup %155 }
 0x196   :  { %117 = vperm.xlu0 %152, %v156_v15  }
 0x215   :  { %v118_v16 = vpop.permute.xlu0 %117 }
 0x216   :  { %v120_v17 = vmul.f32 %v118_v16, %v27_v1  ;;  %v121_v18 = vmul.f32 %v118_v16, %v28_v2 }
 0x218   :  { %122 = vst [vmem:[#allocation5] sm:$0xff] %v120_v17  ;;  %123 = vst [vmem:[#allocation5 + $0x8] sm:$0xff] %v121_v18 }
 0x219   :  { %190 = shalt.err (!%p187_p12)
}
 0x21a   :  { %s191_s30 = scalar_lea.hbm %s263_s3, 256 }
 0x21b   :  { %p192_p13 = scmp.ne.s32.totalorder %s263_s3, %s191_s30  ;;  %p195_p0 = scmp.lt.u32.totalorder %s191_s30, %s263_s3 }
 0x21d   :  { %p197_p1 = pnand %p195_p0, %p192_p13 }
 0x21f   :  { %200 = shalt.err (!%p197_p1)
}
 0x220   :  { %133 = dma.vmem_to_hbm [thread:$0]  %s131_s27, 256, %s263_s3, [#allocation4]  }
 0x221   :  { %203 = dma.done.wait [#allocation4], 256  }
 0x222   :  { %204 = vsyncadd [#allocation4], 4294967040 }
 0x223   :  { %137 = vsyncpa [#allocation3], 1 }
 0x224   :  { %138 = vsyncpa [#allocation4], 1 }

</bundles_post_ra>
